<compile_context>
chip_gen: v5e
topology: v5e:2x2
jax: 0.10.0
libtpu: 0.0.40
codegen_flags: <defaults>
</compile_context>

<pallas_src>
import functools

import jax
import jax.numpy as jnp
from jax.experimental import pallas as pl
from jax.experimental.pallas import tpu as pltpu

EPSILON = 1e-07
LEAKY_SLOPE = 0.01  # torch.nn.LeakyReLU default negative_slope

# "args" equivalents (synthetic config)
WL_ANAPHORICITY_HIDDEN_SIZE = 64
WL_N_HIDDEN_LAYER = 1
# TODO(synk): Dropout omitted (forward/eval semantics => identity).


def _round_up(x, m):
    return ((x + m - 1) // m) * m


def anaphoricity_kernel(m_ref, bm_ref, pw_ref, rough_ref,
                        wa_ref, wb_ref, ws_ref, wpw_ref, b1_ref, wout_ref,
                        out_ref, *, tb, n_ants, hidden):
    e = bm_ref.shape[-1]
    p = pw_ref.shape[-1]
    rows = tb * n_ants

    a2 = m_ref[...]                       # (TB, E)      bf16, sublane-dense
    b3 = bm_ref[...]                      # (TB, A, E)   bf16
    pw3 = pw_ref[...]                     # (TB, A, P)   bf16

    sim3 = a2[:, None, :] * b3            # (TB, A, E)   broadcast over antecedents

    # Free views: n_ants is padded to a multiple of 8 in the wrapper.
    b2 = b3.reshape(rows, e)
    sim2 = sim3.reshape(rows, e)
    pw2 = pw3.reshape(rows, p)

    # pair @ W1 == a@Wa + b@Wb + (a*b)@Wsim + pw@Wpw.
    # Big bf16 contraction over the flattened TB*A rows, f32 accumulation;
    # the mention term is computed once per batch row and broadcast across A.
    h2 = (jnp.dot(b2, wb_ref[...], preferred_element_type=jnp.float32)
          + jnp.dot(sim2, ws_ref[...], preferred_element_type=jnp.float32)
          + jnp.dot(pw2, wpw_ref[...], preferred_element_type=jnp.float32))
    ha = jnp.dot(a2, wa_ref[...], preferred_element_type=jnp.float32)    # (TB, H)

    h3 = (h2.reshape(tb, n_ants, hidden)
          + ha[:, None, :]
          + b1_ref[...][None, :, :])                                     # (TB, A, H) f32
    h3 = jnp.where(h3 > 0, h3, LEAKY_SLOPE * h3)                         # LeakyReLU

    # out-layer Linear(H, 1): VPU multiply + lane reduce (no N=1 MXU pass).
    s = jnp.sum(h3 * wout_ref[...][None, :, :], axis=-1)                 # (TB, A) f32

    # rough already has b_out folded in (done in the wrapper); padded
    # antecedent columns are sliced off in the wrapper.
    out_ref[...] = rough_ref[...] + s                                    # (TB, A)


def anaphoricity_scorer(all_mentions, mentions_batch, pw_batch,
                        top_indices_batch, top_rough_scores_batch, params,
                        *, target_rows=512):
    B, E = mentions_batch.shape
    A = pw_batch.shape[1]
    P = pw_batch.shape[2]
    H = params["b1"].shape[-1]

    # Lane-dense hidden dim (zero-padded hidden units contribute exactly 0).
    Hp = _round_up(H, 128)
    # Sublane-aligned antecedent dim so the in-kernel reshape is a free view.
    Ap = _round_up(A, 8)

    def pad_h(w):
        if Hp == H:
            return w
        return jnp.pad(w, [(0, 0)] * (w.ndim - 1) + [(0, Hp - H)])

    wa = pad_h(params["wa"]).astype(jnp.bfloat16)
    wb = pad_h(params["wb"]).astype(jnp.bfloat16)
    ws = pad_h(params["ws"]).astype(jnp.bfloat16)
    wpw = pad_h(params["wpw"]).astype(jnp.bfloat16)
    b1 = pad_h(params["b1"]).astype(jnp.float32)              # (1, Hp)
    wout_row = pad_h(params["wout"].T).astype(jnp.float32)    # (1, Hp)

    # bf16 activations (the kernel's dots accumulate in f32). Cast
    # all_mentions before the gather so the materialized (B, A, E)
    # intermediate costs half the HBM bytes.
    # TODO(synk): fully fusing the antecedent gather into the kernel needs a
    # manual DMA gather (memory_space=pl.ANY + scalar-prefetched indices);
    # it stays in XLA here.
    b_mentions = jnp.take(all_mentions.astype(jnp.bfloat16),
                          top_indices_batch, axis=0)           # (B, A, E) bf16
    m2 = mentions_batch.astype(jnp.bfloat16)                   # (B, E)    bf16
    pw = pw_batch.astype(jnp.bfloat16)                         # (B, A, P) bf16

    # Fold b_out into the rough scores (free XLA fusion) -> no (1,1) operand.
    rough = (top_rough_scores_batch + params["bout"][0, 0]).astype(jnp.float32)

    # Batch folding: TB batch rows per grid step -> one (TB*Ap, K) MXU pass.
    # TB is a multiple of 16 (bf16 sublane packing), capped near ceil(B/2) so
    # at least two grid steps exist when B allows (megacore sharding).
    tb = max(16, (target_rows // max(Ap, 1)) // 16 * 16)
    tb_half = max(16, _round_up((B + 1) // 2, 16))
    tb = min(tb, tb_half)
    n_steps = pl.cdiv(B, tb)
    b_pad = n_steps * tb

    def pad_to(x, b_target, a_target=None):
        pads = [(0, b_target - x.shape[0])]
        if a_target is not None:
            pads.append((0, a_target - x.shape[1]))
        pads += [(0, 0)] * (x.ndim - len(pads))
        if all(p == (0, 0) for p in pads):
            return x
        return jnp.pad(x, pads)

    m2 = pad_to(m2, b_pad)
    bm = pad_to(b_mentions, b_pad, Ap)
    pw = pad_to(pw, b_pad, Ap)
    rough = pad_to(rough, b_pad, Ap)

    kernel = functools.partial(anaphoricity_kernel, tb=tb, n_ants=Ap, hidden=Hp)

    def tile2(i):
        return (i, 0)

    def tile3(i):
        return (i, 0, 0)

    def bcast2(i):
        return (0, 0)

    out = pl.pallas_call(
        kernel,
        out_shape=jax.ShapeDtypeStruct((b_pad, Ap), jnp.float32),
        grid_spec=pltpu.PrefetchScalarGridSpec(
            num_scalar_prefetch=0,
            grid=(n_steps,),
            in_specs=[
                pl.BlockSpec((tb, E), tile2),       # mentions (sublane-dense)
                pl.BlockSpec((tb, Ap, E), tile3),   # gathered antecedents
                pl.BlockSpec((tb, Ap, P), tile3),   # pairwise features
                pl.BlockSpec((tb, Ap), tile2),      # rough scores (+ b_out)
                pl.BlockSpec((E, Hp), bcast2),      # Wa
                pl.BlockSpec((E, Hp), bcast2),      # Wb
                pl.BlockSpec((E, Hp), bcast2),      # Wsim
                pl.BlockSpec((P, Hp), bcast2),      # Wpw
                pl.BlockSpec((1, Hp), bcast2),      # b1
                pl.BlockSpec((1, Hp), bcast2),      # W_out (as a row)
            ],
            out_specs=pl.BlockSpec((tb, Ap), tile2),
        ),
        compiler_params=pltpu.CompilerParams(
            dimension_semantics=("parallel",),
            vmem_limit_bytes=48 * 1024 * 1024),
    )(m2, bm, pw, rough, wa, wb, ws, wpw, b1, wout_row)

    scores = out[:B, :A]
    dummy = jnp.full((B, 1), EPSILON, scores.dtype)
    return jnp.concatenate([dummy, scores], axis=1)


def reference(all_mentions, mentions_batch, pw_batch,
              top_indices_batch, top_rough_scores_batch, params):
    """Pure-JAX mirror of the PyTorch forward (f32), for correctness checking."""
    B, E = mentions_batch.shape
    A = pw_batch.shape[1]
    a = jnp.broadcast_to(mentions_batch[:, None, :], (B, A, E))
    b = all_mentions[top_indices_batch]
    sim = a * b
    pair = jnp.concatenate([a, b, sim, pw_batch], axis=2)
    w1 = jnp.concatenate(
        [params["wa"], params["wb"], params["ws"], params["wpw"]], axis=0)
    h = pair @ w1 + params["b1"][0]
    h = jnp.where(h > 0, h, LEAKY_SLOPE * h)
    s = (h @ params["wout"])[..., 0] + params["bout"][0, 0]
    scores = top_rough_scores_batch + s
    dummy = jnp.full((B, 1), EPSILON, scores.dtype)
    return jnp.concatenate([dummy, scores], axis=1)


if __name__ == "__main__":
    # Small shapes consistent with the module's forward signature.
    B = 2            # batch_size
    A = 8            # n_ants
    E = 32           # mention_emb
    P = 16           # pw_emb
    N_MENTIONS = 12
    H = WL_ANAPHORICITY_HIDDEN_SIZE      # hidden size (n_hidden_layer = 1)
    IN_FEATURES = 3 * E + P              # pair_emb

    key = jax.random.PRNGKey(0)
    keys = jax.random.split(key, 12)

    all_mentions = jax.random.normal(keys[0], (N_MENTIONS, E), jnp.float32)
    mentions_batch = jax.random.normal(keys[1], (B, E), jnp.float32)
    pw_batch = jax.random.normal(keys[2], (B, A, P), jnp.float32)
    top_indices_batch = jax.random.randint(keys[3], (B, A), 0, N_MENTIONS)
    top_rough_scores_batch = jax.random.normal(keys[4], (B, A), jnp.float32)

    # Deterministic synthetic parameters (Linear(IN_FEATURES, H), Linear(H, 1)).
    params = {
        "wa": 0.05 * jax.random.normal(keys[5], (E, H), jnp.float32),
        "wb": 0.05 * jax.random.normal(keys[6], (E, H), jnp.float32),
        "ws": 0.05 * jax.random.normal(keys[7], (E, H), jnp.float32),
        "wpw": 0.05 * jax.random.normal(keys[8], (P, H), jnp.float32),
        "b1": 0.05 * jax.random.normal(keys[9], (1, H), jnp.float32),
        "wout": 0.05 * jax.random.normal(keys[10], (H, 1), jnp.float32),
        "bout": 0.05 * jax.random.normal(keys[11], (1, 1), jnp.float32),
    }

    out = anaphoricity_scorer(all_mentions, mentions_batch, pw_batch,
                              top_indices_batch, top_rough_scores_batch, params)
    out = jax.block_until_ready(out)

    ref = reference(all_mentions, mentions_batch, pw_batch,
                    top_indices_batch, top_rough_scores_batch, params)
    ref = jax.block_until_ready(ref)

    assert out.shape == (B, A + 1), out.shape
    # bf16 inputs with f32 accumulation: loosened tolerance vs. the f32 reference.
    assert jnp.allclose(out, ref, atol=2e-2, rtol=2e-2), (
        f"max abs err {jnp.max(jnp.abs(out - ref))}")

    print("KERNEL_OK")
</pallas_src>

<mosaic_0001>
module attributes {stable_mosaic.version = 11 : i64} {
  func.func @anaphoricity_kernel(%arg0: i32, %arg1: memref<16x32xbf16, #tpu.memory_space<vmem>>, %arg2: memref<16x8x32xbf16, #tpu.memory_space<vmem>>, %arg3: memref<16x8x16xbf16, #tpu.memory_space<vmem>>, %arg4: memref<16x8xf32, #tpu.memory_space<vmem>>, %arg5: memref<32x128xbf16, #tpu.memory_space<vmem>>, %arg6: memref<32x128xbf16, #tpu.memory_space<vmem>>, %arg7: memref<32x128xbf16, #tpu.memory_space<vmem>>, %arg8: memref<16x128xbf16, #tpu.memory_space<vmem>>, %arg9: memref<1x128xf32, #tpu.memory_space<vmem>>, %arg10: memref<1x128xf32, #tpu.memory_space<vmem>>, %arg11: memref<16x8xf32, #tpu.memory_space<vmem>>) attributes {dimension_semantics = [#tpu.dimension_semantics<parallel>], iteration_bounds = array<i64: 1>, scalar_prefetch = 0 : i64, scratch_operands = 0 : i64, tpu.core_type = #tpu.core_type<tc>, window_params = [{transform_indices = @transform_0, window_bounds = array<i64: 16, 32>}, {transform_indices = @transform_1, window_bounds = array<i64: 16, 8, 32>}, {transform_indices = @transform_2, window_bounds = array<i64: 16, 8, 16>}, {transform_indices = @transform_3, window_bounds = array<i64: 16, 8>}, {pipeline_mode = #tpu.pipeline_mode<synchronous>, transform_indices = @transform_4, window_bounds = array<i64: 32, 128>}, {pipeline_mode = #tpu.pipeline_mode<synchronous>, transform_indices = @transform_5, window_bounds = array<i64: 32, 128>}, {pipeline_mode = #tpu.pipeline_mode<synchronous>, transform_indices = @transform_6, window_bounds = array<i64: 32, 128>}, {pipeline_mode = #tpu.pipeline_mode<synchronous>, transform_indices = @transform_7, window_bounds = array<i64: 16, 128>}, {pipeline_mode = #tpu.pipeline_mode<synchronous>, transform_indices = @transform_8, window_bounds = array<i64: 1, 128>}, {pipeline_mode = #tpu.pipeline_mode<synchronous>, transform_indices = @transform_9, window_bounds = array<i64: 1, 128>}, {transform_indices = @transform_10, window_bounds = array<i64: 16, 8>}]} {
    %c0 = arith.constant 0 : index
    %c0_0 = arith.constant 0 : index
    %0 = vector.load %arg1[%c0, %c0_0] : memref<16x32xbf16, #tpu.memory_space<vmem>>, vector<16x32xbf16>
    %c0_1 = arith.constant 0 : index
    %c0_2 = arith.constant 0 : index
    %c0_3 = arith.constant 0 : index
    %1 = vector.load %arg2[%c0_1, %c0_2, %c0_3] : memref<16x8x32xbf16, #tpu.memory_space<vmem>>, vector<16x8x32xbf16>
    %c0_4 = arith.constant 0 : index
    %c0_5 = arith.constant 0 : index
    %c0_6 = arith.constant 0 : index
    %2 = vector.load %arg3[%c0_4, %c0_5, %c0_6] : memref<16x8x16xbf16, #tpu.memory_space<vmem>>, vector<16x8x16xbf16>
    %3 = vector.shape_cast %0 : vector<16x32xbf16> to vector<16x1x32xbf16>
    %4 = vector.broadcast %3 : vector<16x1x32xbf16> to vector<16x8x32xbf16>
    %5 = arith.mulf %4, %1 : vector<16x8x32xbf16>
    %6 = vector.shape_cast %1 : vector<16x8x32xbf16> to vector<128x32xbf16>
    %7 = vector.shape_cast %5 : vector<16x8x32xbf16> to vector<128x32xbf16>
    %8 = vector.shape_cast %2 : vector<16x8x16xbf16> to vector<128x16xbf16>
    %c0_7 = arith.constant 0 : index
    %c0_8 = arith.constant 0 : index
    %9 = vector.load %arg6[%c0_7, %c0_8] : memref<32x128xbf16, #tpu.memory_space<vmem>>, vector<32x128xbf16>
    %cst = arith.constant dense<0.000000e+00> : vector<128x128xf32>
    %10 = tpu.matmul %6, %9, %cst {dimension_numbers = #tpu.dot_dimension_numbers<[1], [0], [0], [1], [0, 0, 1, 1], [], []>} : vector<128x32xbf16>, vector<32x128xbf16>, vector<128x128xf32> -> vector<128x128xf32>
    %c0_9 = arith.constant 0 : index
    %c0_10 = arith.constant 0 : index
    %11 = vector.load %arg7[%c0_9, %c0_10] : memref<32x128xbf16, #tpu.memory_space<vmem>>, vector<32x128xbf16>
    %cst_11 = arith.constant dense<0.000000e+00> : vector<128x128xf32>
    %12 = tpu.matmul %7, %11, %cst_11 {dimension_numbers = #tpu.dot_dimension_numbers<[1], [0], [0], [1], [0, 0, 1, 1], [], []>} : vector<128x32xbf16>, vector<32x128xbf16>, vector<128x128xf32> -> vector<128x128xf32>
    %13 = arith.addf %10, %12 : vector<128x128xf32>
    %c0_12 = arith.constant 0 : index
    %c0_13 = arith.constant 0 : index
    %14 = vector.load %arg8[%c0_12, %c0_13] : memref<16x128xbf16, #tpu.memory_space<vmem>>, vector<16x128xbf16>
    %cst_14 = arith.constant dense<0.000000e+00> : vector<128x128xf32>
    %15 = tpu.matmul %8, %14, %cst_14 {dimension_numbers = #tpu.dot_dimension_numbers<[1], [0], [0], [1], [0, 0, 1, 1], [], []>} : vector<128x16xbf16>, vector<16x128xbf16>, vector<128x128xf32> -> vector<128x128xf32>
    %16 = arith.addf %13, %15 : vector<128x128xf32>
    %c0_15 = arith.constant 0 : index
    %c0_16 = arith.constant 0 : index
    %17 = vector.load %arg5[%c0_15, %c0_16] : memref<32x128xbf16, #tpu.memory_space<vmem>>, vector<32x128xbf16>
    %cst_17 = arith.constant dense<0.000000e+00> : vector<16x128xf32>
    %18 = tpu.matmul %0, %17, %cst_17 {dimension_numbers = #tpu.dot_dimension_numbers<[1], [0], [0], [1], [0, 0, 1, 1], [], []>} : vector<16x32xbf16>, vector<32x128xbf16>, vector<16x128xf32> -> vector<16x128xf32>
    %19 = vector.shape_cast %16 : vector<128x128xf32> to vector<16x8x128xf32>
    %20 = vector.shape_cast %18 : vector<16x128xf32> to vector<16x1x128xf32>
    %21 = vector.broadcast %20 : vector<16x1x128xf32> to vector<16x8x128xf32>
    %22 = arith.addf %19, %21 : vector<16x8x128xf32>
    %c0_18 = arith.constant 0 : index
    %c0_19 = arith.constant 0 : index
    %23 = vector.load %arg9[%c0_18, %c0_19] : memref<1x128xf32, #tpu.memory_space<vmem>>, vector<1x128xf32>
    %24 = vector.shape_cast %23 : vector<1x128xf32> to vector<1x1x128xf32>
    %25 = vector.broadcast %24 : vector<1x1x128xf32> to vector<16x8x128xf32>
    %26 = arith.addf %22, %25 : vector<16x8x128xf32>
    %cst_20 = arith.constant 0.000000e+00 : f32
    %27 = vector.broadcast %cst_20 : f32 to vector<16x8x128xf32>
    %28 = arith.cmpf ogt, %26, %27 : vector<16x8x128xf32>
    %cst_21 = arith.constant 0.00999999977 : f32
    %29 = vector.broadcast %cst_21 : f32 to vector<16x8x128xf32>
    %30 = arith.mulf %29, %26 : vector<16x8x128xf32>
    %31 = arith.select %28, %26, %30 : vector<16x8x128xi1>, vector<16x8x128xf32>
    %c0_22 = arith.constant 0 : index
    %c0_23 = arith.constant 0 : index
    %32 = vector.load %arg10[%c0_22, %c0_23] : memref<1x128xf32, #tpu.memory_space<vmem>>, vector<1x128xf32>
    %33 = vector.shape_cast %32 : vector<1x128xf32> to vector<1x1x128xf32>
    %34 = vector.broadcast %33 : vector<1x1x128xf32> to vector<16x8x128xf32>
    %35 = arith.mulf %31, %34 : vector<16x8x128xf32>
    %cst_24 = arith.constant dense<0.000000e+00> : vector<16x8xf32>
    %36 = vector.multi_reduction <add>, %35, %cst_24 [2] : vector<16x8x128xf32> to vector<16x8xf32>
    %c0_25 = arith.constant 0 : index
    %c0_26 = arith.constant 0 : index
    %37 = vector.load %arg4[%c0_25, %c0_26] : memref<16x8xf32, #tpu.memory_space<vmem>>, vector<16x8xf32>
    %38 = arith.addf %37, %36 : vector<16x8xf32>
    %c0_27 = arith.constant 0 : index
    %c0_28 = arith.constant 0 : index
    %39 = vector.load %arg11[%c0_27, %c0_28] : memref<16x8xf32, #tpu.memory_space<vmem>>, vector<16x8xf32>
    tpu.vector_store %arg11[%c0_27, %c0_28], %38 {strides = array<i32>} : memref<16x8xf32, #tpu.memory_space<vmem>>, vector<16x8xf32>,
    return
  }
  func.func @transform_0(%arg0: i32) -> (i32, i32) {
    %c0_i32 = arith.constant 0 : i32
    %c0_i32_0 = arith.constant 0 : i32
    return %arg0, %c0_i32 : i32, i32
  }
  func.func @transform_1(%arg0: i32) -> (i32, i32, i32) {
    %c0_i32 = arith.constant 0 : i32
    %c0_i32_0 = arith.constant 0 : i32
    %c0_i32_1 = arith.constant 0 : i32
    return %arg0, %c0_i32, %c0_i32_0 : i32, i32, i32
  }
  func.func @transform_2(%arg0: i32) -> (i32, i32, i32) {
    %c0_i32 = arith.constant 0 : i32
    %c0_i32_0 = arith.constant 0 : i32
    %c0_i32_1 = arith.constant 0 : i32
    return %arg0, %c0_i32, %c0_i32_0 : i32, i32, i32
  }
  func.func @transform_3(%arg0: i32) -> (i32, i32) {
    %c0_i32 = arith.constant 0 : i32
    %c0_i32_0 = arith.constant 0 : i32
    return %arg0, %c0_i32 : i32, i32
  }
  func.func @transform_4(%arg0: i32) -> (i32, i32) {
    %c0_i32 = arith.constant 0 : i32
    %c0_i32_0 = arith.constant 0 : i32
    %c0_i32_1 = arith.constant 0 : i32
    return %c0_i32, %c0_i32_0 : i32, i32
  }
  func.func @transform_5(%arg0: i32) -> (i32, i32) {
    %c0_i32 = arith.constant 0 : i32
    %c0_i32_0 = arith.constant 0 : i32
    %c0_i32_1 = arith.constant 0 : i32
    return %c0_i32, %c0_i32_0 : i32, i32
  }
  func.func @transform_6(%arg0: i32) -> (i32, i32) {
    %c0_i32 = arith.constant 0 : i32
    %c0_i32_0 = arith.constant 0 : i32
    %c0_i32_1 = arith.constant 0 : i32
    return %c0_i32, %c0_i32_0 : i32, i32
  }
  func.func @transform_7(%arg0: i32) -> (i32, i32) {
    %c0_i32 = arith.constant 0 : i32
    %c0_i32_0 = arith.constant 0 : i32
    %c0_i32_1 = arith.constant 0 : i32
    return %c0_i32, %c0_i32_0 : i32, i32
  }
  func.func @transform_8(%arg0: i32) -> (i32, i32) {
    %c0_i32 = arith.constant 0 : i32
    %c0_i32_0 = arith.constant 0 : i32
    %c0_i32_1 = arith.constant 0 : i32
    return %c0_i32, %c0_i32_0 : i32, i32
  }
  func.func @transform_9(%arg0: i32) -> (i32, i32) {
    %c0_i32 = arith.constant 0 : i32
    %c0_i32_0 = arith.constant 0 : i32
    %c0_i32_1 = arith.constant 0 : i32
    return %c0_i32, %c0_i32_0 : i32, i32
  }
  func.func @transform_10(%arg0: i32) -> (i32, i32) {
    %c0_i32 = arith.constant 0 : i32
    %c0_i32_0 = arith.constant 0 : i32
    return %arg0, %c0_i32 : i32, i32
  }
}

</mosaic_0001>

<bundles_post_ra>
// kernel: tpu_custom_call.1
= control target key start
LH: loop header
LB: loop body
LE: loop exit
PB: predicated region body
PF: predicated region fallthrough
CT: control target
= control target key end

     0   :  { %15 = vsyncpa [#allocation3], 0  ;;  %s1609_s0 = inlined_call_operand.vmem [shape: bf16[16,32], index: 0, kind: input, shape index: {}]   ;;  %s1610_s1 = inlined_call_operand.hbm [shape: bf16[16,8,32], index: 1, kind: input, shape index: {}]   ;;  %s1611_s2 = inlined_call_operand.hbm [shape: bf16[16,8,16], index: 2, kind: input, shape index: {}]   ;;  %s1612_s3 = inlined_call_operand.vmem [shape: f32[16,8], index: 3, kind: input, shape index: {}]   ;;  %s1613_s4 = inlined_call_operand.vmem [shape: bf16[32,128], index: 4, kind: input, shape index: {}]   ;;  %s1614_s5 = inlined_call_operand.hbm [shape: bf16[32,128], index: 5, kind: input, shape index: {}]   ;;  %s1615_s6 = inlined_call_operand.hbm [shape: bf16[32,128], index: 6, kind: input, shape index: {}]   ;;  %s1616_s7 = inlined_call_operand.hbm [shape: bf16[16,128], index: 7, kind: input, shape index: {}]   ;;  %s1617_s8 = inlined_call_operand.vmem [shape: f32[1,128], index: 8, kind: input, shape index: {}]   ;;  %s1618_s9 = inlined_call_operand.vmem [shape: f32[1,128], index: 9, kind: input, shape index: {}]   ;;  %s1619_s10 = inlined_call_operand.vmem [shape: f32[16,8], index: 10, kind: output, shape index: {}]  }
   0x1   :  { %16 = vsyncpa [#allocation5], 0 }
   0x2   :  { %17 = vsyncpa [#allocation8], 0  ;;  %s37_s15 = sshll.u32 %s1611_s2, 4  ;;  %s1336_s16 = smov [#allocation4]   ;;  %s38_s15 = int_to_ptr.hbm [resolvable:$true] %s37_s15 }
   0x3   :  { %s39_s17 = sshll.u32 %s1336_s16, 4  ;;  %s67_s20 = sshll.u32 %s1615_s6, 4  ;;  %s40_s17 = int_to_ptr.vmem [resolvable:$true] %s39_s17  ;;  %s68_s20 = int_to_ptr.hbm [resolvable:$true] %s67_s20 }
   0x4   :  { %s1337_s21 = smov 64   ;;  %s1338_s22 = smov 4  }
   0x5   :  { %45 = dma.hbm_to_vmem [thread:$0]  %s38_s15, 1024, %s40_s17, [#allocation5], %s1337_s21, %s1337_s21, %s1338_s22  }
   0x6   :  { %s1339_s23 = smov [#allocation7]   ;;  %s24_s27 = sshll.u32 %s1610_s1, 4  ;;  %s25_s27 = int_to_ptr.hbm [resolvable:$true] %s24_s27 }
   0x7   :  { %s69_s24 = sshll.u32 %s1339_s23, 4  ;;  %s54_s29 = sshll.u32 %s1614_s5, 4  ;;  %s70_s24 = int_to_ptr.vmem [resolvable:$true] %s69_s24  ;;  %s55_s29 = int_to_ptr.hbm [resolvable:$true] %s54_s29 }
   0x8   :  { %75 = dma.hbm_to_vmem [thread:$0]  %s68_s20, 256, %s70_s24, [#allocation8], %s1337_s21, %s1337_s21, %s1338_s22  }
   0x9   :  { %s1340_s30 = smov [#allocation2]   ;;  %s1341_s6 = smov [#allocation6]  }
   0xa   :  { %s26_s11 = sshll.u32 %s1340_s30, 4  ;;  %s56_s12 = sshll.u32 %s1341_s6, 4  ;;  %s27_s11 = int_to_ptr.vmem [resolvable:$true] %s26_s11  ;;  %s57_s12 = int_to_ptr.vmem [resolvable:$true] %s56_s12 }
   0xb   :  { %32 = dma.hbm_to_vmem [thread:$0]  %s25_s27, 1024, %s27_s11, [#allocation3], %s1337_s21, %s1337_s21, %s1338_s22  }
   0xc   :  { %s80_s15 = sshll.u32 %s1616_s7, 4  ;;  %s1342_s1 = smov [#allocation9]   ;;  %s81_s15 = int_to_ptr.hbm [resolvable:$true] %s80_s15 }
   0xd   :  { %62 = dma.hbm_to_vmem [thread:$0]  %s55_s29, 256, %s57_s12, [#allocation5], %s1337_s21, %s1337_s21, %s1338_s22  }
   0xe   :  { %s82_s16 = sshll.u32 %s1342_s1, 4  ;;  %s83_s16 = int_to_ptr.vmem [resolvable:$true] %s82_s16 }
   0xf   :  { %88 = dma.hbm_to_vmem [thread:$0]  %s81_s15, 128, %s83_s16, [#allocation8], %s1337_s21, %s1337_s21, %s1338_s22  }
  0x10   :  { %1330 = dma.done.wait [#allocation3], 1024  }
  0x11   :  { %1331 = vsyncadd [#allocation3], 4294966272 }
  0x12   :  { %1332 = dma.done.wait [#allocation5], 1280  }
  0x13   :  { %1333 = vsyncadd [#allocation5], 4294966016 }
  0x14   :  { %1334 = dma.done.wait [#allocation8], 384  }
  0x15   :  { %1335 = vsyncadd [#allocation8], 4294966912  ;;  %v1190_v0 = vld [vmem:[#allocation6 + $0x8] sm:$0xff]  ;;  %v1413_v1 = vld [vmem:[#allocation9] sm:$0xff]  ;;  %vm665_vm0 = vcmask 130048   ;;  %vm152_vm1 = vcmask 1040384  }
  0x16   :  { %v1181_v2 = vld [vmem:[#allocation4] sm:$0xff]  ;;  %v1192_v3 = vld [vmem:[#allocation7 + $0x8] sm:$0xff]  ;;  %574 = vmatpush.bf16.msra.mxu1 %v1190_v0  ;;  %697 = vmatpush.bf16.msra.mxu2 %v1413_v1  ;;  %vm157_vm2 = vcmask 1041409   ;;  %v1191_v6 = vld [vmem:[#allocation7] sm:$0xff]  ;;  %vm165_vm3 = vcmask 1043459   ;;  %vm418_vm4 = vcmask 261120  }
  0x17   :  { %v1189_v4 = vld [vmem:[#allocation6] sm:$0xff]  ;;  %449 = vmatpush.bf16.msra.mxu0 %v1192_v3  ;;  %1196 = vmatpush.bf16.msra.mxu3 %v1192_v3  ;;  %vm161_vm5 = vcmask 1042434   ;;  %v130_v35 = vld [vmem:[#allocation2 + $0x38] sm:$0xff]   ;;  %v1182_v53 = vld [vmem:[#allocation4 + $0x8] sm:$0xff] }
  0x18   :  { %v1419_v5 = vld [vmem:[%s1609_s0] sm:$0xf]  ;;  %v1427_v8 = vld [vmem:[%s1609_s0 + $0x4] sm:$0xf]  ;;  %v324_v47 = vunpack.c.l.bf16 %v130_v35  ;;  %v325_v52 = vunpack.c.h.bf16 %v130_v35  ;;  %v118_v54 = vld [vmem:[#allocation2 + $0x8] sm:$0xff]  }
  0x19   :  { %v1422_v7 = vrot.slane %v1419_v5, 3  ;;  %v1430_v9 = vrot.slane %v1427_v8, 3  ;;  %1151 = vmatmul.msk.bf16.vlgmr.msra.gmra.mxu2 %vm665_vm0, %v1181_v2  ;;  %v1173_v10 = vld [vmem:[#allocation2] sm:$0xff] }
  0x1a   :  { %575 = vmatpush.bf16.msra.mxu1 %v1189_v4  ;;  %v116_v22 = vld [vmem:[#allocation2] sm:$0xff]  }
  0x1b   :  { %v155_v11 = vsel %vm152_vm1, %v1419_v5, %v1422_v7  ;;  %v158_v12 = vsel %vm157_vm2, %v1419_v5, %v1422_v7  ;;  %v179_v15 = vsel %vm165_vm3, %v1427_v8, %v1430_v9  ;;  %450 = vmatpush.bf16.msra.mxu0 %v1191_v6  ;;  %1197 = vmatpush.bf16.msra.mxu3 %v1191_v6  ;;  %v310_v34 = vunpack.c.l.bf16 %v116_v22 }
  0x1c   :  { %v183_v13 = vunpack.i.h.s16 %v155_v11  ;;  %v1043_v14 = vpack.i.b16 %v155_v11, %v155_v11  ;;  %v160_v16 = vrot.slane %v158_v12, 1  ;;  %v181_v17 = vrot.slane %v179_v15, 3 }
  0x1d   :  { %1107 = vmatmul.msk.bf16.vlgmr.msra.gmra.mxu1 %vm418_vm4, %v1173_v10  ;;  %v162_v25 = vsel %vm161_vm5, %v1419_v5, %v1422_v7  ;;  %v311_v37 = vunpack.c.h.bf16 %v116_v22 }
  0x1e   :  { %v199_v18 = vpack.i.b16 %v183_v13, %v183_v13  ;;  %v214_v19 = vperm.slane %v1043_v14, 0  ;;  %v185_v20 = vunpack.i.h.s16 %v160_v16  ;;  %v1044_v21 = vpack.i.b16 %v160_v16, %v160_v16 }
  0x1f   :  { %1198 = vmatpush.bf16.msrb.mxu3 %v1190_v0  ;;  %v197_v23 = vunpack.i.h.s16 %v181_v17  ;;  %v1050_v24 = vpack.i.b16 %v181_v17, %v181_v17  ;;  %v164_v40 = vrot.slane %v162_v25, 2  ;;  %v312_v0 = vunpack.c.l.bf16 %v118_v54 }
  0x20   :  { %v215_v26 = vperm.slane %v199_v18, 0  ;;  %v231_v27 = vpack.i.b16 %v214_v19, %v214_v19  ;;  %v201_v28 = vpack.i.b16 %v185_v20, %v185_v20  ;;  %v216_v29 = vperm.slane %v1044_v21, 0 }
  0x21   :  { %v213_v30 = vpack.i.b16 %v197_v23, %v197_v23  ;;  %v228_v31 = vperm.slane %v1050_v24, 0  ;;  %v187_v55 = vunpack.i.h.s16 %v164_v40  ;;  %v1045_v6 = vpack.i.b16 %v164_v40, %v164_v40 }
  0x22   :  { %v233_v32 = vperm.slane %v231_v27, 0  ;;  %v235_v33 = vpack.i.b16 %v215_v26, %v215_v26  ;;  %v217_v36 = vperm.slane %v201_v28, 0  ;;  %v239_v43 = vpack.i.b16 %v216_v29, %v216_v29 }
  0x23   :  { %1199 = vmatpush.bf16.msrb.mxu3 %v1189_v4  ;;  %v229_v38 = vperm.slane %v213_v30, 0  ;;  %v287_v39 = vpack.i.b16 %v228_v31, %v228_v31  ;;  %v1174_v4 = vld [vmem:[#allocation2 + $0x8] sm:$0xff]  ;;  %v203_v10 = vpack.i.b16 %v187_v55, %v187_v55  ;;  %v313_v14 = vunpack.c.h.bf16 %v118_v54  ;;  %v1183_v30 = vld [vmem:[#allocation4 + $0x10] sm:$0xff]  ;;  %v1184_v54 = vld [vmem:[#allocation4 + $0x18] sm:$0xff] }
  0x24   :  { %v237_v41 = vperm.slane %v235_v33, 0  ;;  %v294_v42 = vunpack.c.l.bf16 %v233_v32  ;;  %v243_v44 = vpack.i.b16 %v217_v36, %v217_v36  ;;  %v241_v58 = vperm.slane %v239_v43, 0  ;;  %v120_v36 = vld [vmem:[#allocation2 + $0x10] sm:$0xff]   ;;  %v1180_v43 = vld [vmem:[#allocation2 + $0x38] sm:$0xff] }
  0x25   :  { %v289_v45 = vperm.slane %v287_v39, 0  ;;  %v291_v46 = vpack.i.b16 %v229_v38, %v229_v38  ;;  %v218_v19 = vperm.slane %v1045_v6, 0  ;;  %v219_v20 = vperm.slane %v203_v10, 0 }
  0x26   :  { %v295_v48 = vunpack.c.l.bf16 %v237_v41  ;;  %v326_v49 = vmul.f32 %v310_v34, %v294_v42  ;;  %v245_v59 = vperm.slane %v243_v44, 0  ;;  %v296_v12 = vunpack.c.l.bf16 %v241_v58 }
  0x27   :  { %v293_v50 = vperm.slane %v291_v46, 0  ;;  %v308_v51 = vunpack.c.l.bf16 %v289_v45  ;;  %v166_v23 = vsel %vm165_vm3, %v1419_v5, %v1422_v7  ;;  %v247_v25 = vpack.i.b16 %v218_v19, %v218_v19  ;;  %v1175_v5 = vld [vmem:[#allocation2 + $0x10] sm:$0xff] }
  0x28   :  { %v327_v56 = vmul.f32 %v311_v37, %v295_v48  ;;  %v342_v57 = vpack.c.bf16 %v326_v49, %v326_v49  ;;  %v297_v13 = vunpack.c.l.bf16 %v245_v59  ;;  %v328_v21 = vmul.f32 %v312_v0, %v296_v12  ;;  %v1195_v48 = vld [vmem:[%s1613_s4 + $0x8] sm:$0xff]  ;;  %v122_v59 = vld [vmem:[#allocation2 + $0x18] sm:$0xff]  }
  0x29   :  { %v309_v60 = vunpack.c.l.bf16 %v293_v50  ;;  %v340_v61 = vmul.f32 %v324_v47, %v308_v51  ;;  %1152 = vmatmul.msk.bf16.gmra.mxu2 %vm665_vm0, %v1182_v53  ;;  %v251_v26 = vpack.i.b16 %v219_v20, %v219_v20  ;;  %v168_v27 = vrot.slane %v166_v23, 3  ;;  %v1194_v53 = vld [vmem:[%s1613_s4] sm:$0xff] }
  0x2a   :  { %v343_v62 = vpack.c.bf16 %v327_v56, %v327_v56  ;;  %v382_v63 = vunpack.c.l.b16 %v342_v57  ;;  %v329_v22 = vmul.f32 %v313_v14, %v297_v13  ;;  %v344_v28 = vpack.c.bf16 %v328_v21, %v328_v21  ;;  %v1185_v23 = vld [vmem:[#allocation4 + $0x20] sm:$0xff] }
  0x2b   :  { %v341_v2 = vmul.f32 %v325_v52, %v309_v60  ;;  %v356_v3 = vpack.c.bf16 %v340_v61, %v340_v61  ;;  %v249_v31 = vperm.slane %v247_v25, 0  ;;  %v253_v32 = vperm.slane %v251_v26, 0 }
  0x2c   :  { %v383_v11 = vunpack.c.l.b16 %v343_v62  ;;  %v345_v29 = vpack.c.bf16 %v329_v22, %v329_v22  ;;  %v189_v33 = vunpack.i.h.s16 %v168_v27  ;;  %v384_v34 = vunpack.c.l.b16 %v344_v28  ;;  %v1176_v62 = vld [vmem:[#allocation2 + $0x18] sm:$0xff] }
  0x2d   :  { %v357_v15 = vpack.c.bf16 %v341_v2, %v341_v2  ;;  %v396_v16 = vunpack.c.l.b16 %v356_v3  ;;  %1108 = vmatmul.msk.bf16.gmra.mxu1 %vm418_vm4, %v1174_v4  ;;  %v298_v7 = vunpack.c.l.bf16 %v249_v31  ;;  %v299_v37 = vunpack.c.l.bf16 %v253_v32 }
  0x2e   :  { %v398_v17 = vpack.c.b16 %v383_v11, %v382_v63  ;;  %v385_v35 = vunpack.c.l.b16 %v345_v29  ;;  %v1046_v38 = vpack.i.b16 %v168_v27, %v168_v27  ;;  %v205_v39 = vpack.i.b16 %v189_v33, %v189_v33  ;;  %v1188_v11 = vld [vmem:[#allocation4 + $0x38] sm:$0xff]  ;;  %v124_v27 = vld [vmem:[#allocation2 + $0x20] sm:$0xff]  }
  0x2f   :  { %v397_v18 = vunpack.c.l.b16 %v357_v15  ;;  %v314_v41 = vunpack.c.l.bf16 %v120_v36  ;;  %v315_v42 = vunpack.c.h.bf16 %v120_v36  ;;  %v173_v61 = vsel %vm157_vm2, %v1427_v8, %v1430_v9 }
  0x30   :  { %1059 = vmatmul.msk.bf16.vlgmr.msra.gmra.mxu0 %vm418_vm4, %v398_v17  ;;  %v399_v40 = vpack.c.b16 %v385_v35, %v384_v34  ;;  %v220_v44 = vperm.slane %v1046_v38, 0  ;;  %v221_v45 = vperm.slane %v205_v39, 0  ;;  %v316_v2 = vunpack.c.l.bf16 %v122_v59 }
  0x31   :  { %v405_v24 = vpack.c.b16 %v397_v18, %v396_v16  ;;  %v330_v46 = vmul.f32 %v314_v41, %v298_v7  ;;  %v331_v47 = vmul.f32 %v315_v42, %v299_v37  ;;  %v317_v3 = vunpack.c.h.bf16 %v122_v59 }
  0x32   :  { %v255_v49 = vpack.i.b16 %v220_v44, %v220_v44  ;;  %v259_v50 = vpack.i.b16 %v221_v45, %v221_v45  ;;  %v175_v18 = vrot.slane %v173_v61, 1  ;;  %v176_v28 = vsel %vm161_vm5, %v1427_v8, %v1430_v9 }
  0x33   :  { %1066 = vmatmul.msk.bf16.vlgmr.msra.gmra.mxu3 %vm418_vm4, %v405_v24  ;;  %v346_v51 = vpack.c.bf16 %v330_v46, %v330_v46  ;;  %v347_v52 = vpack.c.bf16 %v331_v47, %v331_v47  ;;  %v318_v35 = vunpack.c.l.bf16 %v124_v27  ;;  %v319_v36 = vunpack.c.h.bf16 %v124_v27  ;;  %v126_v47 = vld [vmem:[#allocation2 + $0x28] sm:$0xff]  }
  0x34   :  { %1200 = vmatpush.bf16.msra.mxu3 %v1413_v1  ;;  %v171_v1 = vsel %vm152_vm1, %v1427_v8, %v1430_v9  ;;  %v257_v55 = vperm.slane %v255_v49, 0  ;;  %v261_v56 = vperm.slane %v259_v50, 0  ;;  %v193_v24 = vunpack.i.h.s16 %v175_v18  ;;  %v1178_v49 = vld [vmem:[#allocation2 + $0x28] sm:$0xff] }
  0x35   :  { %v386_v57 = vunpack.c.l.b16 %v346_v51  ;;  %v387_v58 = vunpack.c.l.b16 %v347_v52  ;;  %v191_v60 = vunpack.i.h.s16 %v171_v1  ;;  %v1047_v6 = vpack.i.b16 %v171_v1, %v171_v1  ;;  %v1186_v1 = vld [vmem:[#allocation4 + $0x28] sm:$0xff] }
  0x36   :  { %v300_v63 = vunpack.c.l.bf16 %v257_v55  ;;  %v301_v0 = vunpack.c.l.bf16 %v261_v56  ;;  %v1048_v31 = vpack.i.b16 %v175_v18, %v175_v18  ;;  %v209_v32 = vpack.i.b16 %v193_v24, %v193_v24 }
  0x37   :  { %v400_v4 = vpack.c.b16 %v387_v58, %v386_v57  ;;  %v207_v10 = vpack.i.b16 %v191_v60, %v191_v60  ;;  %v222_v14 = vperm.slane %v1047_v6, 0  ;;  %v178_v42 = vrot.slane %v176_v28, 2 }
  0x38   :  { %v332_v12 = vmul.f32 %v316_v2, %v300_v63  ;;  %v333_v13 = vmul.f32 %v317_v3, %v301_v0  ;;  %v224_v7 = vperm.slane %v1048_v31, 0  ;;  %v225_v37 = vperm.slane %v209_v32, 0 }
  0x39   :  { %1153 = vmatmul.msk.bf16.gmra.mxu2 %vm665_vm0, %v1183_v30  ;;  %v223_v15 = vperm.slane %v207_v10, 0  ;;  %v263_v19 = vpack.i.b16 %v222_v14, %v222_v14  ;;  %v1177_v30 = vld [vmem:[#allocation2 + $0x20] sm:$0xff]  ;;  %v320_v52 = vunpack.c.l.bf16 %v126_v47  ;;  %v1049_v55 = vpack.i.b16 %v178_v42, %v178_v42 }
  0x3a   :  { %v348_v16 = vpack.c.bf16 %v332_v12, %v332_v12  ;;  %v349_v17 = vpack.c.bf16 %v333_v13, %v333_v13  ;;  %v271_v38 = vpack.i.b16 %v224_v7, %v224_v7  ;;  %v275_v39 = vpack.i.b16 %v225_v37, %v225_v37  ;;  %v1179_v13 = vld [vmem:[#allocation2 + $0x30] sm:$0xff] }
  0x3b   :  { %v267_v20 = vpack.i.b16 %v223_v15, %v223_v15  ;;  %v265_v25 = vperm.slane %v263_v19, 0  ;;  %v226_v59 = vperm.slane %v1049_v55, 0 }
  0x3c   :  { %v388_v21 = vunpack.c.l.b16 %v348_v16  ;;  %v389_v22 = vunpack.c.l.b16 %v349_v17  ;;  %v277_v44 = vperm.slane %v275_v39, 0 }
  0x3d   :  { %1109 = vmatmul.msk.bf16.gmra.mxu1 %vm418_vm4, %v1175_v5  ;;  %v269_v26 = vperm.slane %v267_v20, 0  ;;  %v302_v33 = vunpack.c.l.bf16 %v265_v25  ;;  %v1172_v5 = vld [vmem:[%s1609_s0] sm:$0xff]  ;;  %v279_v63 = vpack.i.b16 %v226_v59, %v226_v59 }
  0x3e   :  { %v401_v29 = vpack.c.b16 %v389_v22, %v388_v21  ;;  %v305_v51 = vunpack.c.l.bf16 %v277_v44 }
  0x3f   :  { %v303_v34 = vunpack.c.l.bf16 %v269_v26  ;;  %v334_v8 = vmul.f32 %v318_v35, %v302_v33  ;;  %v281_v6 = vperm.slane %v279_v63, 0  ;;  %v1517_v63 = vld [vmem:[%s1617_s8] ss:$0 sm:$0xff] }
  0x40   :  { %1060 = vmatmul.msk.bf16.gmra.mxu0 %vm418_vm4, %v399_v40 }
  0x41   :  { %v335_v9 = vmul.f32 %v319_v36, %v303_v34  ;;  %v350_v40 = vpack.c.bf16 %v334_v8, %v334_v8  ;;  %v306_v14 = vunpack.c.l.bf16 %v281_v6 }
  0x43   :  { %1114 = vmatmul.msk.bf16.vlgmr.msrb.gmra.mxu3 %vm418_vm4, %v1180_v43  ;;  %v351_v41 = vpack.c.bf16 %v335_v9, %v335_v9  ;;  %v273_v43 = vperm.slane %v271_v38, 0  ;;  %v390_v45 = vunpack.c.l.b16 %v350_v40 }
  0x44   :  { %783 = vmatpush.bf16.msrb.mxu3 %v1195_v48  ;;  %v195_v48 = vunpack.i.h.s16 %v178_v42 }
  0x45   :  { %v391_v46 = vunpack.c.l.b16 %v351_v41  ;;  %v304_v50 = vunpack.c.l.bf16 %v273_v43 }
  0x46   :  { %v211_v56 = vpack.i.b16 %v195_v48, %v195_v48 }
  0x47   :  { %v336_v57 = vmul.f32 %v320_v52, %v304_v50 }
  0x48   :  { %784 = vmatpush.bf16.msrb.mxu3 %v1194_v53  ;;  %v321_v53 = vunpack.c.h.bf16 %v126_v47  ;;  %v227_v60 = vperm.slane %v211_v56, 0 }
  0x49   :  { %1154 = vmatmul.msk.bf16.gmra.mxu2 %vm665_vm0, %v1184_v54  ;;  %v402_v54 = vpack.c.b16 %v391_v46, %v390_v45  ;;  %v352_v61 = vpack.c.bf16 %v336_v57, %v336_v57 }
  0x4a   :  { %v337_v58 = vmul.f32 %v321_v53, %v305_v51  ;;  %v283_v0 = vpack.i.b16 %v227_v60, %v227_v60 }
  0x4b   :  { %v392_v2 = vunpack.c.l.b16 %v352_v61 }
  0x4c   :  { %v285_v10 = vperm.slane %v283_v0, 0 }
  0x4d   :  { %1110 = vmatmul.msk.bf16.gmra.mxu1 %vm418_vm4, %v1176_v62  ;;  %v353_v62 = vpack.c.bf16 %v337_v58, %v337_v58 }
  0x4e   :  { %v307_v15 = vunpack.c.l.bf16 %v285_v10 }
  0x4f   :  { %v393_v3 = vunpack.c.l.b16 %v353_v62 }
  0x50   :  { %1061 = vmatmul.msk.bf16.gmra.mxu0 %vm418_vm4, %v400_v4  ;;  %v1187_v4 = vld [vmem:[#allocation4 + $0x30] sm:$0xff] }
  0x51   :  { %v403_v12 = vpack.c.b16 %v393_v3, %v392_v2 }
  0x53   :  { %1158 = vmatmul.msk.bf16.vlgmr.msra.gmra.mxu3 %vm665_vm0, %v1188_v11  ;;  %v128_v11 = vld [vmem:[#allocation2 + $0x30] sm:$0xff]  }
  0x54   :  { %v322_v16 = vunpack.c.l.bf16 %v128_v11  ;;  %v323_v17 = vunpack.c.h.bf16 %v128_v11 }
  0x56   :  { %v338_v18 = vmul.f32 %v322_v16, %v306_v14  ;;  %v339_v19 = vmul.f32 %v323_v17, %v307_v15 }
  0x58   :  { %v354_v20 = vpack.c.bf16 %v338_v18, %v338_v18  ;;  %v355_v21 = vpack.c.bf16 %v339_v19, %v339_v19 }
  0x59   :  { %1155 = vmatmul.msk.bf16.gmra.mxu2 %vm665_vm0, %v1185_v23 }
  0x5a   :  { %v394_v22 = vunpack.c.l.b16 %v354_v20  ;;  %v395_v23 = vunpack.c.l.b16 %v355_v21 }
  0x5c   :  { %v404_v24 = vpack.c.b16 %v395_v23, %v394_v22  ;;  %v1528_v23 = vld [vmem:[%s1618_s9] ss:$0 sm:$0xff] }
  0x5d   :  { %1111 = vmatmul.msk.bf16.gmra.mxu1 %vm418_vm4, %v1177_v30 }
  0x60   :  { %1062 = vmatmul.msk.bf16.gmra.mxu0 %vm418_vm4, %v401_v29 }
  0x63   :  { %1171 = vmatmul.msk.bf16.vlgmr.msrb.gmra.mxu3 %vm418_vm4, %v1172_v5 }
  0x69   :  { %1156 = vmatmul.msk.bf16.gmra.mxu2 %vm665_vm0, %v1186_v1 }
  0x6d   :  { %1112 = vmatmul.msk.bf16.gmra.mxu1 %vm418_vm4, %v1178_v49 }
  0x70   :  { %1063 = vmatmul.msk.bf16.gmra.mxu0 %vm418_vm4, %v402_v54 }
  0x79   :  { %1157 = vmatmul.msk.bf16.gmra.mxu2 %vm665_vm0, %v1187_v4 }
  0x7d   :  { %1113 = vmatmul.msk.bf16.gmra.mxu1 %vm418_vm4, %v1179_v13 }
  0x80   :  { %1064 = vmatmul.msk.bf16.gmra.mxu0 %vm418_vm4, %v403_v12 }
  0x90   :  { %1065 = vmatmul.msk.bf16.gmra.mxu0 %vm418_vm4, %v404_v24 }
  0x9a   :  { %v577_v25 = vpop.f32.mrf.mxu1 }
  0x9c   :  { %v699_v26 = vpop.f32.mrf.mxu2 }
  0xa2   :  { %v579_v27 = vpop.f32.mrf.mxu1 }
  0xa4   :  { %v701_v28 = vpop.f32.mrf.mxu2 }
  0xaa   :  { %v582_v29 = vpop.f32.mrf.mxu1 }
  0xac   :  { %v704_v31 = vpop.f32.mrf.mxu2 }
  0xad   :  { %v452_v30 = vpop.f32.mrf.mxu0 }
  0xae   :  { %v578_v51 = vadd.f32 %v577_v25, %v452_v30 }
  0xb0   :  { %v739_v58 = vadd.f32 %v699_v26, %v578_v51 }
  0xb2   :  { %v584_v32 = vpop.f32.mrf.mxu1 }
  0xb4   :  { %v706_v35 = vpop.f32.mrf.mxu2 }
  0xb5   :  { %v454_v33 = vpop.f32.mrf.mxu0 }
  0xb6   :  { %v487_v34 = vpop.f32.mrf.mxu3  ;;  %v580_v52 = vadd.f32 %v579_v27, %v454_v33 }
  0xb8   :  { %v740_v59 = vadd.f32 %v701_v28, %v580_v52 }
  0xba   :  { %v587_v36 = vpop.f32.mrf.mxu1 }
  0xbc   :  { %v709_v37 = vpop.f32.mrf.mxu2 }
  0xbd   :  { %v457_v5 = vpop.f32.mrf.mxu0 }
  0xbe   :  { %v489_v7 = vpop.f32.mrf.mxu3  ;;  %v583_v54 = vadd.f32 %v582_v29, %v457_v5 }
  0xc0   :  { %v741_v4 = vadd.f32 %v704_v31, %v583_v54 }
  0xc2   :  { %v589_v9 = vpop.f32.mrf.mxu1 }
  0xc4   :  { %v711_v40 = vpop.f32.mrf.mxu2 }
  0xc5   :  { %v459_v8 = vpop.f32.mrf.mxu0 }
  0xc6   :  { %v612_v38 = vpop.f32.mrf.mxu3  ;;  %v585_v16 = vadd.f32 %v584_v32, %v459_v8 }
  0xc7   :  { %v1491_v39 = vadd.f32 %v612_v38, %v487_v34 }
  0xc8   :  { %v742_v31 = vadd.f32 %v706_v35, %v585_v16 }
  0xca   :  { %v1495_v43 = vpop.f32.mrf.mxu1 }
  0xcc   :  { %v1497_v44 = vpop.f32.mrf.mxu2 }
  0xcd   :  { %v462_v41 = vpop.f32.mrf.mxu0 }
  0xce   :  { %v614_v42 = vpop.f32.mrf.mxu3  ;;  %v588_v60 = vadd.f32 %v587_v36, %v462_v41 }
  0xcf   :  { %v1493_v1 = vadd.f32 %v614_v42, %v489_v7 }
  0xd0   :  { %v743_v17 = vadd.f32 %v709_v37, %v588_v60 }
  0xd2   :  { %v1501_v47 = vpop.f32.mrf.mxu1 }
  0xd4   :  { %v1503_v48 = vpop.f32.mrf.mxu2 }
  0xd5   :  { %v464_v45 = vpop.f32.mrf.mxu0 }
  0xd6   :  { %v1499_v46 = vpop.f32.mrf.mxu3  ;;  %v590_v55 = vadd.f32 %v589_v9, %v464_v45 }
  0xd8   :  { %v744_v6 = vadd.f32 %v711_v40, %v590_v55 }
  0xda   :  { %v597_v53 = vpop.f32.mrf.mxu1 }
  0xdc   :  { %v719_v57 = vpop.f32.mrf.mxu2 }
  0xdd   :  { %v1505_v49 = vpop.f32.mrf.mxu0 }
  0xde   :  { %v1507_v50 = vpop.f32.mrf.mxu3 }
  0xe2   :  { %v599_v27 = vpop.f32.mrf.mxu1 }
  0xe4   :  { %v721_v36 = vpop.f32.mrf.mxu2 }
  0xe5   :  { %v1509_v56 = vpop.f32.mrf.mxu0 }
  0xe6   :  { %v1511_v61 = vpop.f32.mrf.mxu3 }
  0xe7   :  { %v807_v62 = vperm.slane %v1511_v61, 0  ;;  %v794_v0 = vrot.slane %v1511_v61, 2  ;;  %v797_v2 = vrot.slane %v1511_v61, 5  ;;  %v793_v3 = vrot.slane %v1511_v61, 1 }
  0xe8   :  { %v796_v10 = vrot.slane %v1511_v61, 4  ;;  %v795_v11 = vrot.slane %v1511_v61, 3  ;;  %v798_v9 = vrot.slane %v1511_v61, 6 }
  0xe9   :  { %v839_v12 = vadd.f32 %v807_v62, %v739_v58  ;;  %v809_v13 = vperm.slane %v794_v0, 0  ;;  %v812_v14 = vperm.slane %v797_v2, 0  ;;  %v808_v15 = vperm.slane %v793_v3, 0 }
  0xea   :  { %v811_v18 = vperm.slane %v796_v10, 0  ;;  %v810_v25 = vperm.slane %v795_v11, 0  ;;  %v813_v0 = vperm.slane %v798_v9, 0 }
  0xeb   :  { %v859_v19 = vadd.f32 %v1517_v63, %v839_v12  ;;  %v841_v20 = vadd.f32 %v809_v13, %v741_v4  ;;  %v844_v21 = vadd.f32 %v812_v14, %v744_v6  ;;  %v840_v22 = vadd.f32 %v808_v15, %v740_v59  ;;  %v602_v6 = vpop.f32.mrf.mxu1 }
  0xec   :  { %v843_v24 = vadd.f32 %v811_v18, %v743_v17  ;;  %v842_v42 = vadd.f32 %v810_v25, %v742_v31  ;;  %v724_v12 = vpop.f32.mrf.mxu2 }
  0xed   :  { %v472_v26 = vpop.f32.mrf.mxu0  ;;  %vm875_vm6 = vcmp.gt.f32.partialorder %v859_v19, 0.0  ;;  %v891_v28 = vmul.f32 0.01, %v859_v19  ;;  %v861_v29 = vadd.f32 %v1517_v63, %v841_v20  ;;  %v864_v30 = vadd.f32 %v1517_v63, %v844_v21 }
  0xee   :  { %v598_v32 = vadd.f32 %v597_v53, %v472_v26  ;;  %v860_v33 = vadd.f32 %v1517_v63, %v840_v22  ;;  %v863_v34 = vadd.f32 %v1517_v63, %v843_v24  ;;  %v1536_v40 = vpop.f32.mrf.mxu3  ;;  %v593_v53 = vadd.f32 %v1495_v43, %v1505_v49 }
  0xef   :  { %v907_v5 = vsel %vm875_vm6, %v859_v19, %v891_v28  ;;  %vm877_vm7 = vcmp.gt.f32.partialorder %v861_v29, 0.0  ;;  %v893_v7 = vmul.f32 0.01, %v861_v29  ;;  %vm880_vm8 = vcmp.gt.f32.partialorder %v864_v30, 0.0 }
  0xf0   :  { %v927_v37 = vmul.f32 %v1528_v23, %v907_v5  ;;  %v896_v8 = vmul.f32 0.01, %v864_v30  ;;  %v747_v38 = vadd.f32 %v719_v57, %v598_v32  ;;  %v892_v35 = vmul.f32 0.01, %v860_v33 }
  0xf1   :  { %v909_v41 = vsel %vm877_vm7, %v861_v29, %v893_v7  ;;  %v800_v52 = vrot.slane %v1536_v40, 1  ;;  %vm876_vm9 = vcmp.gt.f32.partialorder %v860_v33, 0.0  ;;  %v895_v55 = vmul.f32 0.01, %v863_v34 }
  0xf2   :  { %943 = vadd.xlane.f32.xlu0 %v927_v37  ;;  %v929_v45 = vmul.f32 %v1528_v23, %v909_v41  ;;  %v912_v51 = vsel %vm880_vm8, %v864_v30, %v896_v8  ;;  %v815_v57 = vperm.slane %v1536_v40, 0  ;;  %vm879_vm10 = vcmp.gt.f32.partialorder %v863_v34, 0.0 }
  0xf3   :  { %v932_v54 = vmul.f32 %v1528_v23, %v912_v51  ;;  %v908_v59 = vsel %vm876_vm9, %v860_v33, %v892_v35  ;;  %v862_v62 = vadd.f32 %v1517_v63, %v842_v42  ;;  %v816_v3 = vperm.slane %v800_v52, 0  ;;  %v604_v31 = vpop.f32.mrf.mxu1 }
  0xf4   :  { %947 = vadd.xlane.f32.xlu2 %v929_v45  ;;  %v847_v60 = vadd.f32 %v815_v57, %v747_v38  ;;  %v745_v4 = vadd.f32 %v1497_v44, %v593_v53  ;;  %v911_v43 = vsel %vm879_vm10, %v863_v34, %v895_v55  ;;  %v928_v11 = vmul.f32 %v1528_v23, %v908_v59  ;;  %v726_v5 = vpop.f32.mrf.mxu2 }
  0xf5   :  { %953 = vadd.xlane.f32.xlu1 %v932_v54  ;;  %v474_v58 = vpop.f32.mrf.mxu0  ;;  %v894_v14 = vmul.f32 0.01, %v862_v62  ;;  %v931_v17 = vmul.f32 %v1528_v23, %v911_v43  ;;  %vm878_vm12 = vcmp.gt.f32.partialorder %v862_v62, 0.0  ;;  %v801_v20 = vrot.slane %v1536_v40, 2 }
  0xf6   :  { %v600_v2 = vadd.f32 %v599_v27, %v474_v58  ;;  %v867_v49 = vadd.f32 %v1517_v63, %v847_v60  ;;  %v845_v15 = vadd.f32 %v813_v0, %v745_v4  ;;  %v802_v37 = vrot.slane %v1536_v40, 3 }
  0xf7   :  { %v910_v22 = vsel %vm878_vm12, %v862_v62, %v894_v14  ;;  %v817_v28 = vperm.slane %v801_v20, 0  ;;  %v753_v42 = vadd.f32 %v1499_v46, %v1491_v39  ;;  %v806_v55 = vrot.slane %v1536_v40, 7 }
  0xf8   :  { %v748_v10 = vadd.f32 %v721_v36, %v600_v2  ;;  %vm883_vm11 = vcmp.gt.f32.partialorder %v867_v49, 0.0  ;;  %v899_v13 = vmul.f32 0.01, %v867_v49  ;;  %v865_v24 = vadd.f32 %v1517_v63, %v845_v15 }
  0xf9   :  { %v930_v29 = vmul.f32 %v1528_v23, %v910_v22  ;;  %v805_v36 = vrot.slane %v1536_v40, 6  ;;  %v818_v51 = vperm.slane %v802_v37, 0  ;;  %v803_v62 = vrot.slane %v1536_v40, 4 }
  0xfa   :  { %v848_v16 = vadd.f32 %v816_v3, %v748_v10  ;;  %945 = vadd.xlane.f32.xlu0 %v928_v11  ;;  %v915_v18 = vsel %vm883_vm11, %v867_v49, %v899_v13  ;;  %v897_v32 = vmul.f32 0.01, %v865_v24  ;;  %vm881_vm14 = vcmp.gt.f32.partialorder %v865_v24, 0.0 }
  0xfb   :  { %v935_v19 = vmul.f32 %v1528_v23, %v915_v18  ;;  %v821_v35 = vperm.slane %v805_v36, 0  ;;  %v607_v59 = vpop.f32.mrf.mxu1  ;;  %v822_v46 = vperm.slane %v806_v55, 0  ;;  %v819_v49 = vperm.slane %v803_v62, 0 }
  0xfc   :  { %v868_v44 = vadd.f32 %v1517_v63, %v848_v16  ;;  %951 = vadd.xlane.f32.xlu2 %v931_v17  ;;  %v913_v9 = vsel %vm881_vm14, %v865_v24, %v897_v32  ;;  %v729_v0 = vpop.f32.mrf.mxu2  ;;  %v595_v11 = vadd.f32 %v1501_v47, %v1509_v56  ;;  %v799_v14 = vrot.slane %v1511_v61, 7 }
  0xfd   :  { %v477_v21 = vpop.f32.mrf.mxu0  ;;  %959 = vadd.xlane.f32.xlu1 %v935_v19  ;;  %v933_v52 = vmul.f32 %v1528_v23, %v913_v9  ;;  %v853_v58 = vadd.f32 %v821_v35, %v753_v42  ;;  %v804_v18 = vrot.slane %v1536_v40, 5  ;;  %vm1014_vm9 = vcmask 1044484  }
  0xfe   :  { %v603_v25 = vadd.f32 %v602_v6, %v477_v21  ;;  %vm884_vm13 = vcmp.gt.f32.partialorder %v868_v44, 0.0  ;;  %v900_v26 = vmul.f32 0.01, %v868_v44  ;;  %v754_v6 = vadd.f32 %v1507_v50, %v1493_v1 }
  0xff   :  { %v873_v4 = vadd.f32 %v1517_v63, %v853_v58  ;;  %v746_v1 = vadd.f32 %v1503_v48, %v595_v11  ;;  %v814_v47 = vperm.slane %v799_v14, 0  ;;  %v820_v24 = vperm.slane %v804_v18, 0 }
 0x100   :  { %v749_v27 = vadd.f32 %v724_v12, %v603_v25  ;;  %v916_v30 = vsel %vm884_vm13, %v868_v44, %v900_v26  ;;  %v854_v13 = vadd.f32 %v822_v46, %v754_v6  ;;  %vm1016_vm10 = vcmask 1045509  }
 0x101   :  { %v936_v34 = vmul.f32 %v1528_v23, %v916_v30  ;;  %v905_v16 = vmul.f32 0.01, %v873_v4  ;;  %vm889_vm1 = vcmp.gt.f32.partialorder %v873_v4, 0.0  ;;  %v846_v48 = vadd.f32 %v814_v47, %v746_v1  ;;  %v976_v1 = vld [vmem:[%s1612_s3 + $0x8] sm:$0xff] }
 0x102   :  { %v849_v33 = vadd.f32 %v817_v28, %v749_v27  ;;  %949 = vadd.xlane.f32.xlu0 %v930_v29  ;;  %v874_v19 = vadd.f32 %v1517_v63, %v854_v13  ;;  %vm1020_vm11 = vcmask 1047559  }
 0x103   :  { %v609_v50 = vpop.f32.mrf.mxu1  ;;  %v921_v20 = vsel %vm889_vm1, %v873_v4, %v905_v16  ;;  %v866_v32 = vadd.f32 %v1517_v63, %v846_v48 }
 0x104   :  { %v869_v7 = vadd.f32 %v1517_v63, %v849_v33  ;;  %v731_v61 = vpop.f32.mrf.mxu2  ;;  %v941_v26 = vmul.f32 %v1528_v23, %v921_v20  ;;  %v906_v28 = vmul.f32 0.01, %v874_v19  ;;  %vm890_vm6 = vcmp.gt.f32.partialorder %v874_v19, 0.0 }
 0x105   :  { %v479_v8 = vpop.f32.mrf.mxu0  ;;  %961 = vadd.xlane.f32.xlu1 %v936_v34  ;;  %vm882_vm8 = vcmp.gt.f32.partialorder %v866_v32, 0.0 }
 0x106   :  { %v605_v38 = vadd.f32 %v604_v31, %v479_v8  ;;  %vm885_vm15 = vcmp.gt.f32.partialorder %v869_v7, 0.0  ;;  %v901_v41 = vmul.f32 0.01, %v869_v7  ;;  %v922_v30 = vsel %vm890_vm6, %v874_v19, %v906_v28 }
 0x107   :  { %v942_v34 = vmul.f32 %v1528_v23, %v922_v30 }
 0x108   :  { %v750_v45 = vadd.f32 %v726_v5, %v605_v38  ;;  %v917_v53 = vsel %vm885_vm15, %v869_v7, %v901_v41  ;;  %v898_v5 = vmul.f32 0.01, %v866_v32 }
 0x109   :  { %v937_v54 = vmul.f32 %v1528_v23, %v917_v53 }
 0x10a   :  { %v850_v57 = vadd.f32 %v818_v51, %v750_v45  ;;  %955 = vadd.xlane.f32.xlu0 %v933_v52  ;;  %v914_v7 = vsel %vm882_vm8, %v866_v32, %v898_v5  ;;  %v993_v52 = vlaneseq }
 0x10b   :  { %963 = vadd.xlane.f32.xlu2 %v937_v54  ;;  %v934_v37 = vmul.f32 %v1528_v23, %v914_v7 }
 0x10c   :  { %v870_v60 = vadd.f32 %v1517_v63, %v850_v57  ;;  %v994_v57 = vand.u32 127, %v993_v52 }
 0x10d   :  { %v482_v39 = vpop.f32.mrf.mxu0 }
 0x10e   :  { %v608_v2 = vadd.f32 %v607_v59, %v482_v39  ;;  %vm886_vm0 = vcmp.gt.f32.partialorder %v870_v60, 0.0  ;;  %v902_v3 = vmul.f32 0.01, %v870_v60 }
 0x110   :  { %v751_v43 = vadd.f32 %v729_v0, %v608_v2  ;;  %v918_v10 = vsel %vm886_vm0, %v870_v60, %v902_v3 }
 0x111   :  { %v938_v12 = vmul.f32 %v1528_v23, %v918_v10 }
 0x112   :  { %v851_v15 = vadd.f32 %v819_v49, %v751_v43 }
 0x113   :  { %965 = vadd.xlane.f32.xlu1 %v938_v12 }
 0x114   :  { %v871_v17 = vadd.f32 %v1517_v63, %v851_v15 }
 0x115   :  { %v484_v44 = vpop.f32.mrf.mxu0 }
 0x116   :  { %v610_v56 = vadd.f32 %v609_v50, %v484_v44  ;;  %vm887_vm4 = vcmp.gt.f32.partialorder %v871_v17, 0.0  ;;  %v903_v21 = vmul.f32 0.01, %v871_v17 }
 0x118   :  { %v752_v22 = vadd.f32 %v731_v61, %v610_v56  ;;  %v919_v25 = vsel %vm887_vm4, %v871_v17, %v903_v21 }
 0x119   :  { %v939_v27 = vmul.f32 %v1528_v23, %v919_v25 }
 0x11a   :  { %v852_v40 = vadd.f32 %v820_v24, %v752_v22  ;;  %v975_v24 = vld [vmem:[%s1612_s3] sm:$0xff] }
 0x11b   :  { %971 = vadd.xlane.f32.xlu1 %v941_v26  ;;  %967 = vadd.xlane.f32.xlu0 %v939_v27 }
 0x11c   :  { %v872_v29 = vadd.f32 %v1517_v63, %v852_v40 }
 0x11e   :  { %vm888_vm7 = vcmp.gt.f32.partialorder %v872_v29, 0.0  ;;  %v904_v31 = vmul.f32 0.01, %v872_v29 }
 0x120   :  { %v920_v33 = vsel %vm888_vm7, %v872_v29, %v904_v31 }
 0x121   :  { %v940_v36 = vmul.f32 %v1528_v23, %v920_v33 }
 0x123   :  { %973 = vadd.xlane.f32.xlu0 %v942_v34  ;;  %969 = vadd.xlane.f32.xlu2 %v940_v36 }
 0x12b   :  { %957 = vadd.xlane.f32.xlu2 %v934_v37 }
 0x165   :  { %v944_v8 = vpop.xlane.xlu0 %943 }
 0x166   :  { %v995_v62 = vperm.slane %v944_v8, %v994_v57 }
 0x167   :  { %v948_v35 = vpop.xlane.xlu2 %947 }
 0x168   :  { %v954_v9 = vpop.xlane.xlu1 %953  ;;  %v997_v6 = vperm.slane %v948_v35, %v994_v57 }
 0x169   :  { %v1000_v21 = vperm.slane %v954_v9, %v994_v57 }
 0x16d   :  { %v946_v38 = vpop.xlane.xlu0 %945 }
 0x16e   :  { %v996_v58 = vperm.slane %v946_v38, %v994_v57 }
 0x16f   :  { %v952_v45 = vpop.xlane.xlu2 %951 }
 0x170   :  { %v960_v41 = vpop.xlane.xlu1 %959  ;;  %v1011_v46 = vsel %vm157_vm2, %v996_v58, %v995_v62  ;;  %v999_v50 = vperm.slane %v952_v45, %v994_v57 }
 0x171   :  { %v1003_v23 = vperm.slane %v960_v41, %v994_v57  ;;  %v1012_v13 = vsel %vm161_vm5, %v997_v6, %v1011_v46 }
 0x175   :  { %v950_v42 = vpop.xlane.xlu0 %949 }
 0x176   :  { %v998_v2 = vperm.slane %v950_v42, %v994_v57 }
 0x178   :  { %v962_v63 = vpop.xlane.xlu1 %961  ;;  %v1013_v16 = vsel %vm165_vm3, %v998_v2, %v1012_v13 }
 0x179   :  { %v1004_v59 = vperm.slane %v962_v63, %v994_v57  ;;  %v1015_v47 = vsel %vm1014_vm9, %v999_v50, %v1013_v16 }
 0x17a   :  { %v1017_v22 = vsel %vm1016_vm10, %v1000_v21, %v1015_v47 }
 0x17b   :  { %v1022_v3 = vsel %vm157_vm2, %v1004_v59, %v1003_v23  ;;  %vm1018_vm2 = vcmask 1046534  }
 0x17d   :  { %v956_v51 = vpop.xlane.xlu0 %955 }
 0x17e   :  { %v964_v54 = vpop.xlane.xlu2 %963  ;;  %v1001_v56 = vperm.slane %v956_v51, %v994_v57 }
 0x17f   :  { %v1005_v60 = vperm.slane %v964_v54, %v994_v57 }
 0x180   :  { %v1019_v26 = vsel %vm1018_vm2, %v1001_v56, %v1017_v22 }
 0x181   :  { %v1023_v43 = vsel %vm161_vm5, %v1005_v60, %v1022_v3  ;;  %vm1033_vm5 = vcmask 64512  }
 0x186   :  { %v966_v53 = vpop.xlane.xlu1 %965 }
 0x187   :  { %v1006_v0 = vperm.slane %v966_v53, %v994_v57 }
 0x189   :  { %v1024_v11 = vsel %vm165_vm3, %v1006_v0, %v1023_v43 }
 0x18e   :  { %v968_v55 = vpop.xlane.xlu0 %967  ;;  %v972_v4 = vpop.xlane.xlu1 %971 }
 0x18f   :  { %v1007_v39 = vperm.slane %v968_v55, %v994_v57  ;;  %v1009_v14 = vperm.slane %v972_v4, %v994_v57 }
 0x191   :  { %v1025_v15 = vsel %vm1014_vm9, %v1007_v39, %v1024_v11 }
 0x196   :  { %v974_v49 = vpop.xlane.xlu0 %973  ;;  %v970_v10 = vpop.xlane.xlu2 %969 }
 0x197   :  { %v1008_v12 = vperm.slane %v970_v10, %v994_v57  ;;  %v1010_v17 = vperm.slane %v974_v49, %v994_v57 }
 0x199   :  { %v1026_v18 = vsel %vm1016_vm10, %v1008_v12, %v1025_v15 }
 0x19a   :  { %v1027_v44 = vsel %vm1018_vm2, %v1009_v14, %v1026_v18 }
 0x19b   :  { %v1028_v19 = vsel %vm1020_vm11, %v1010_v17, %v1027_v44 }
 0x19c   :  { %v1032_v20 = vadd.f32 %v1028_v19, %v976_v1 }
 0x19e   :  { %1035 = vst.msk [vmem:[%s1619_s10 + $0x8] sm:$0xff] %vm1033_vm5, %v1032_v20  ;;  %v958_v61 = vpop.xlane.xlu2 %957 }
 0x19f   :  { %v1002_v25 = vperm.slane %v958_v61, %v994_v57 }
 0x1a1   :  { %v1021_v27 = vsel %vm1020_vm11, %v1002_v25, %v1019_v26 }
 0x1a2   :  { %v1031_v40 = vadd.f32 %v1021_v27, %v975_v24 }
 0x1a4   :  { %1034 = vst.msk [vmem:[%s1619_s10] sm:$0xff] %vm1033_vm5, %v1031_v40 }
 0x1a5   :  { %1040 = vsyncpa [#allocation3], 1 }
 0x1a6   :  { %1041 = vsyncpa [#allocation5], 1 }
 0x1a7   :  { %1042 = vsyncpa [#allocation8], 1 }

</bundles_post_ra>
